<compile_context>
chip_gen: v5e
topology: v5e:2x2
jax: 0.10.0
libtpu: 0.0.40
codegen_flags: <defaults>
</compile_context>

<pallas_src>
import functools
import math

import jax
import jax.numpy as jnp
from jax.experimental import pallas as pl
from jax.experimental.pallas import tpu as pltpu

NEG_INF = -1e12  # the reference uses -1e12 for '-inf'


def _choose_ti(L, target=32):
    """Largest i-tile TI <= target with L % TI == 0 and TI % 8 == 0 (or TI == L)."""
    best = None
    for d in range(1, min(L, target) + 1):
        if L % d == 0 and (d % 8 == 0 or d == L):
            best = d
    return best if best is not None else L


# ----------------------------- Pallas kernel ------------------------------ #
def _txmutihead_kernel(*refs, has_rel: bool):
    """One (i-tile, batch) block per grid step.

    xi_ref:  (1, TI, H)   rows i of x for this tile
    xf_ref:  (1, L, H)    full x (all j)
    ai_ref:  (1, TI, Hh)  a_proj tile  = x @ (Wh0 + Wh2) + bh
    bf_ref:  (1, L, Hh)   b_proj       = x @ (Wh1 - Wh2)
    rel_ref: (TI, L, Hh)  rel_proj tile (only when has_rel)
    mi_ref:  (1, TI, 1)   mask[i]  (column layout)
    mf_ref:  (1, L, 1)    mask[j]  (column layout)
    wh3_ref: (H, Hh)      Wh chunk for the Hadamard term
    wo_ref:  (Hh, C)
    bo_ref:  (1, C)
    out_ref: (1, TI, L, C) masked logits (i, j, class)
    """
    if has_rel:
        (xi_ref, xf_ref, ai_ref, bf_ref, rel_ref,
         mi_ref, mf_ref, wh3_ref, wo_ref, bo_ref, out_ref) = refs
    else:
        (xi_ref, xf_ref, ai_ref, bf_ref,
         mi_ref, mf_ref, wh3_ref, wo_ref, bo_ref, out_ref) = refs
        rel_ref = None

    TI = xi_ref.shape[1]
    H = xi_ref.shape[2]
    L = xf_ref.shape[1]
    Hh = ai_ref.shape[2]
    C = out_ref.shape[3]
    f32 = jnp.float32

    i_base = pl.program_id(0) * TI

    xi = xi_ref[0].astype(f32)               # (TI, H)
    xj = xf_ref[0].astype(f32)               # (L, H)

    # The only per-pair GEMM: (x_i * x_j) @ Wh3  (bilinear term).
    pm = xi[:, None, :] * xj[None, :, :]     # (TI, L, H)
    acc = jnp.dot(pm.reshape(TI * L, H), wh3_ref[...].astype(f32),
                  preferred_element_type=f32).reshape(TI, L, Hh)

    # Per-token linear terms (bias folded into a_proj) + relative-position projection.
    acc = acc + ai_ref[0][:, None, :] + bf_ref[0][None, :, :]
    if has_rel:
        acc = acc + rel_ref[...].astype(f32)

    hij = jnp.tanh(acc)                      # (TI, L, Hh)

    logits = jnp.dot(hij.reshape(TI * L, Hh), wo_ref[...].astype(f32),
                     preferred_element_type=f32) + bo_ref[...].astype(f32)
    logits = logits.reshape(TI, L, C)

    # add_mask_tril: sequence mask over i, over j, then strict-lower-triangle penalty
    # (same order as the reference).
    m_i = mi_ref[0][:, :, None].astype(f32)  # (TI, 1, 1) = mask[i]
    m_j = mf_ref[0][None, :, :].astype(f32)  # (1, L, 1)  = mask[j]
    y = logits * m_i + NEG_INF * (1.0 - m_i)
    y = y * m_j + NEG_INF * (1.0 - m_j)
    row = i_base + jax.lax.broadcasted_iota(jnp.int32, (TI, L, 1), 0)
    col = jax.lax.broadcasted_iota(jnp.int32, (TI, L, 1), 1)
    y = y - jnp.where(row > col, 1e12, 0.0)

    out_ref[...] = y[None].astype(out_ref.dtype)


# ------------------------- positional encodings (glue) --------------------- #
def sinusoidal_position_embedding(seq_len, output_dim):
    """SinusoidalPositionEmbedding(output_dim, 'add') additive term, shape (L, output_dim)."""
    pos = jnp.arange(seq_len, dtype=jnp.float32)
    idx = jnp.arange(output_dim // 2, dtype=jnp.float32)
    inv = jnp.power(10000.0, -2.0 * idx / output_dim)
    ang = pos[:, None] * inv[None, :]                                    # (L, D/2)
    return jnp.stack([jnp.sin(ang), jnp.cos(ang)], axis=-1).reshape(seq_len, output_dim)


def relative_position_encoding(depth, max_length=512, max_relative_position=127):
    vocab_size = max_relative_position * 2 + 1
    r = jnp.arange(max_length)
    distance = r[None, :] - r[:, None]                                   # j - i
    final = jnp.clip(distance, -max_relative_position, max_relative_position) + max_relative_position
    position = jnp.arange(vocab_size, dtype=jnp.float32)[:, None]
    div_term = jnp.exp(jnp.arange(0, depth, 2, dtype=jnp.float32) * (-math.log(10000.0) / depth))
    table = jnp.stack([jnp.sin(position * div_term), jnp.cos(position * div_term)],
                      axis=-1).reshape(vocab_size, depth)
    return table[final]                                                  # (max_length, max_length, depth)


# --------------------------------- module ---------------------------------- #
class TxMutiheadPallas:
    def __init__(self, hidden_size, c_size, abPosition=False, rePosition=False,
                 maxlen=None, max_relative=None, key=None):
        self.hidden_size = hidden_size
        self.c_size = c_size
        self.abPosition = abPosition
        self.rePosition = rePosition
        if key is None:
            key = jax.random.PRNGKey(0)
        k1, k2, k3, k4 = jax.random.split(key, 4)
        fan_h = 4 * hidden_size
        bh_bound = 1.0 / math.sqrt(fan_h)
        bo_bound = 1.0 / math.sqrt(hidden_size)
        # Wh: Linear(4H -> H), stored directly as the (4H, H) matmul matrix (= torch weight.T).
        self.wh = jax.random.uniform(k1, (fan_h, hidden_size), jnp.float32, -bh_bound, bh_bound)
        self.bh = jax.random.uniform(k2, (1, hidden_size), jnp.float32, -bh_bound, bh_bound)
        # Wo: Linear(H -> c_size), stored as (H, C).
        self.wo = jax.random.uniform(k3, (hidden_size, c_size), jnp.float32, -bo_bound, bo_bound)
        self.bo = jax.random.uniform(k4, (1, c_size), jnp.float32, -bo_bound, bo_bound)
        if rePosition:
            self.rel_table = relative_position_encoding(
                depth=4 * hidden_size, max_length=maxlen, max_relative_position=max_relative)
        else:
            self.rel_table = None

    def __call__(self, inputs, mask):
        B, L, H = inputs.shape
        assert H == self.hidden_size
        Hh = self.hidden_size
        C = self.c_size
        f32 = jnp.float32
        # Precompute glue runs at high precision (amortized; it is O(L*H^2), not O(L^2*H^2)).
        hp = jax.lax.Precision.HIGHEST

        x = inputs.astype(f32)
        if self.abPosition:
            x = x + sinusoidal_position_embedding(L, H)[None, :, :]

        wh4 = self.wh.reshape(4, H, Hh)
        # Per-token projections of the linear part of concat_x @ Wh (bias folded into a_proj).
        a_proj = jnp.einsum('blh,hk->blk', x, wh4[0] + wh4[2], precision=hp) + self.bh  # (B, L, Hh)
        b_proj = jnp.einsum('blh,hk->blk', x, wh4[1] - wh4[2], precision=hp)            # (B, L, Hh)

        has_rel = self.rel_table is not None
        if has_rel:
            rel = self.rel_table[:L, :L, :].astype(f32)                                  # (L, L, 4H)
            rel_proj = jnp.einsum('ijd,dk->ijk', rel, self.wh, precision=hp)             # (L, L, Hh)

        mask_col = mask.astype(f32).reshape(B, L, 1)

        TI = _choose_ti(L)
        nT = L // TI
        grid = (nT, B)  # batch is the fastest axis -> each rel_proj tile is reused across the batch

        in_specs = [
            pl.BlockSpec((1, TI, H), lambda t, b: (b, t, 0)),      # x rows i (tile)
            pl.BlockSpec((1, L, H), lambda t, b: (b, 0, 0)),       # x all rows (j)
            pl.BlockSpec((1, TI, Hh), lambda t, b: (b, t, 0)),     # a_proj tile
            pl.BlockSpec((1, L, Hh), lambda t, b: (b, 0, 0)),      # b_proj
        ]
        args = [x, x, a_proj, b_proj]
        if has_rel:
            in_specs.append(pl.BlockSpec((TI, L, Hh), lambda t, b: (t, 0, 0)))  # rel_proj tile
            args.append(rel_proj)
        in_specs += [
            pl.BlockSpec((1, TI, 1), lambda t, b: (b, t, 0)),      # mask[i] (column layout)
            pl.BlockSpec((1, L, 1), lambda t, b: (b, 0, 0)),       # mask[j] (column layout)
            pl.BlockSpec((H, Hh), lambda t, b: (0, 0)),            # Wh3 (Hadamard chunk)
            pl.BlockSpec((Hh, C), lambda t, b: (0, 0)),            # Wo
            pl.BlockSpec((1, C), lambda t, b: (0, 0)),             # bo
        ]
        args += [mask_col, mask_col, wh4[3], self.wo, self.bo]

        flops = 2 * B * L * L * (H * Hh + Hh * C)
        bytes_accessed = 4 * (2 * B * L * H + 2 * B * L * Hh + L * L * Hh
                              + B * L * L * C + H * Hh + Hh * C + 2 * B * L)
        cost = pl.CostEstimate(flops=flops,
                               transcendentals=B * L * L * Hh,
                               bytes_accessed=bytes_accessed)

        out_llc = pl.pallas_call(
            functools.partial(_txmutihead_kernel, has_rel=has_rel),
            out_shape=jax.ShapeDtypeStruct((B, L, L, C), f32),
            grid=grid,
            in_specs=in_specs,
            out_specs=pl.BlockSpec((1, TI, L, C), lambda t, b: (b, t, 0, 0)),
            compiler_params=pltpu.CompilerParams(
                dimension_semantics=("parallel", "parallel"),
                vmem_limit_bytes=64 * 1024 * 1024),
            cost_estimate=cost,
        )(*args)

        # PyTorch returns logits.permute(0, 3, 1, 2): (B, C, L, L) — done as XLA glue.
        return jnp.transpose(out_llc, (0, 3, 1, 2))


# ------------------------------ pure-JAX reference ------------------------- #
def reference_forward(inputs, mask, model):
    B, L, H = inputs.shape
    prec = jax.lax.Precision.HIGHEST
    x = inputs.astype(jnp.float32)
    if model.abPosition:
        x = x + sinusoidal_position_embedding(L, H)[None, :, :]
    x2 = jnp.broadcast_to(x[:, :, None, :], (B, L, L, H))   # x_i
    x1 = jnp.broadcast_to(x[:, None, :, :], (B, L, L, H))   # x_j
    concat = jnp.concatenate([x2, x1, x2 - x1, x2 * x1], axis=-1)
    if model.rel_table is not None:
        concat = concat + model.rel_table[:L, :L, :]
    h = jnp.tanh(jnp.dot(concat, model.wh, precision=prec) + model.bh[0])
    logits = jnp.dot(h, model.wo, precision=prec) + model.bo[0]
    logits = jnp.transpose(logits, (0, 3, 1, 2))             # (B, C, L, L)
    m = mask.astype(jnp.float32)
    mi = m[:, None, :, None]
    mj = m[:, None, None, :]
    logits = logits * mi + NEG_INF * (1.0 - mi)
    logits = logits * mj + NEG_INF * (1.0 - mj)
    tril = jnp.tril(jnp.ones((L, L), jnp.float32), k=-1)
    logits = logits - tril * 1e12
    return logits


if __name__ == "__main__":
    B, L, H, C = 2, 8, 32, 4
    key = jax.random.PRNGKey(0)
    kx, kp = jax.random.split(key)

    inputs = jax.random.normal(kx, (B, L, H), jnp.float32)
    lengths = jnp.array([L, 5], jnp.int32)
    mask = (jnp.arange(L)[None, :] < lengths[:, None]).astype(jnp.float32)

    model = TxMutiheadPallas(hidden_size=H, c_size=C,
                             abPosition=True, rePosition=True,
                             maxlen=16, max_relative=4, key=kp)

    out = model(inputs, mask)
    out = jax.block_until_ready(out)
    assert out.shape == (B, C, L, L)

    ref = reference_forward(inputs, mask, model)
    # Kernel matmuls use default (fast, bf16-pass) MXU precision with f32 accumulation,
    # so compare with a correspondingly relaxed tolerance.
    if not jnp.allclose(out, ref, rtol=2e-2, atol=5e-2):
        max_err = jnp.max(jnp.abs(out - ref))
        raise AssertionError(f"kernel mismatch, max abs err = {max_err}")

    print("KERNEL_OK")
</pallas_src>

<mosaic_0001>
module attributes {stable_mosaic.version = 11 : i64} {
  func.func @_txmutihead_kernel(%arg0: i32, %arg1: i32, %arg2: memref<1x8x32xf32, #tpu.memory_space<vmem>>, %arg3: memref<1x8x32xf32, #tpu.memory_space<vmem>>, %arg4: memref<1x8x32xf32, #tpu.memory_space<vmem>>, %arg5: memref<1x8x32xf32, #tpu.memory_space<vmem>>, %arg6: memref<8x8x32xf32, #tpu.memory_space<vmem>>, %arg7: memref<1x8x1xf32, #tpu.memory_space<vmem>>, %arg8: memref<1x8x1xf32, #tpu.memory_space<vmem>>, %arg9: memref<32x32xf32, #tpu.memory_space<vmem>>, %arg10: memref<32x4xf32, #tpu.memory_space<vmem>>, %arg11: memref<1x4xf32, #tpu.memory_space<vmem>>, %arg12: memref<1x8x8x4xf32, #tpu.memory_space<vmem>>) attributes {dimension_semantics = [#tpu.dimension_semantics<parallel>, #tpu.dimension_semantics<parallel>], iteration_bounds = array<i64: 1, 2>, scalar_prefetch = 0 : i64, scratch_operands = 0 : i64, tpu.core_type = #tpu.core_type<tc>, window_params = [{transform_indices = @transform_0, window_bounds = array<i64: 1, 8, 32>}, {transform_indices = @transform_1, window_bounds = array<i64: 1, 8, 32>}, {transform_indices = @transform_2, window_bounds = array<i64: 1, 8, 32>}, {transform_indices = @transform_3, window_bounds = array<i64: 1, 8, 32>}, {transform_indices = @transform_4, window_bounds = array<i64: 8, 8, 32>}, {transform_indices = @transform_5, window_bounds = array<i64: 1, 8, 1>}, {transform_indices = @transform_6, window_bounds = array<i64: 1, 8, 1>}, {pipeline_mode = #tpu.pipeline_mode<synchronous>, transform_indices = @transform_7, window_bounds = array<i64: 32, 32>}, {pipeline_mode = #tpu.pipeline_mode<synchronous>, transform_indices = @transform_8, window_bounds = array<i64: 32, 4>}, {pipeline_mode = #tpu.pipeline_mode<synchronous>, transform_indices = @transform_9, window_bounds = array<i64: 1, 4>}, {transform_indices = @transform_10, window_bounds = array<i64: 1, 8, 8, 4>}]} {
    %c8_i32 = arith.constant 8 : i32
    %0 = arith.muli %arg0, %c8_i32 : i32
    %c0 = arith.constant 0 : index
    %c0_0 = arith.constant 0 : index
    %c0_1 = arith.constant 0 : index
    %1 = vector.load %arg2[%c0, %c0_0, %c0_1] : memref<1x8x32xf32, #tpu.memory_space<vmem>>, vector<1x8x32xf32>
    %2 = vector.shape_cast %1 : vector<1x8x32xf32> to vector<8x32xf32>
    %c0_2 = arith.constant 0 : index
    %c0_3 = arith.constant 0 : index
    %c0_4 = arith.constant 0 : index
    %3 = vector.load %arg3[%c0_2, %c0_3, %c0_4] : memref<1x8x32xf32, #tpu.memory_space<vmem>>, vector<1x8x32xf32>
    %4 = vector.shape_cast %3 : vector<1x8x32xf32> to vector<8x32xf32>
    %5 = vector.shape_cast %2 : vector<8x32xf32> to vector<8x1x32xf32>
    %6 = vector.shape_cast %4 : vector<8x32xf32> to vector<1x8x32xf32>
    %7 = vector.broadcast %5 : vector<8x1x32xf32> to vector<8x8x32xf32>
    %8 = vector.broadcast %6 : vector<1x8x32xf32> to vector<8x8x32xf32>
    %9 = arith.mulf %7, %8 : vector<8x8x32xf32>
    %10 = vector.shape_cast %9 : vector<8x8x32xf32> to vector<64x32xf32>
    %c0_5 = arith.constant 0 : index
    %c0_6 = arith.constant 0 : index
    %11 = vector.load %arg9[%c0_5, %c0_6] : memref<32x32xf32, #tpu.memory_space<vmem>>, vector<32x32xf32>
    %cst = arith.constant dense<0.000000e+00> : vector<64x32xf32>
    %12 = tpu.matmul %10, %11, %cst {dimension_numbers = #tpu.dot_dimension_numbers<[1], [0], [0], [1], [0, 0, 1, 1], [], []>} : vector<64x32xf32>, vector<32x32xf32>, vector<64x32xf32> -> vector<64x32xf32>
    %13 = vector.shape_cast %12 : vector<64x32xf32> to vector<8x8x32xf32>
    %c0_7 = arith.constant 0 : index
    %c0_8 = arith.constant 0 : index
    %c0_9 = arith.constant 0 : index
    %14 = vector.load %arg4[%c0_7, %c0_8, %c0_9] : memref<1x8x32xf32, #tpu.memory_space<vmem>>, vector<1x8x32xf32>
    %15 = vector.shape_cast %14 : vector<1x8x32xf32> to vector<8x32xf32>
    %16 = vector.shape_cast %15 : vector<8x32xf32> to vector<8x1x32xf32>
    %17 = vector.broadcast %16 : vector<8x1x32xf32> to vector<8x8x32xf32>
    %18 = arith.addf %13, %17 : vector<8x8x32xf32>
    %c0_10 = arith.constant 0 : index
    %c0_11 = arith.constant 0 : index
    %c0_12 = arith.constant 0 : index
    %19 = vector.load %arg5[%c0_10, %c0_11, %c0_12] : memref<1x8x32xf32, #tpu.memory_space<vmem>>, vector<1x8x32xf32>
    %20 = vector.shape_cast %19 : vector<1x8x32xf32> to vector<8x32xf32>
    %21 = vector.shape_cast %20 : vector<8x32xf32> to vector<1x8x32xf32>
    %22 = vector.broadcast %21 : vector<1x8x32xf32> to vector<8x8x32xf32>
    %23 = arith.addf %18, %22 : vector<8x8x32xf32>
    %c0_13 = arith.constant 0 : index
    %c0_14 = arith.constant 0 : index
    %c0_15 = arith.constant 0 : index
    %24 = vector.load %arg6[%c0_13, %c0_14, %c0_15] : memref<8x8x32xf32, #tpu.memory_space<vmem>>, vector<8x8x32xf32>
    %25 = arith.addf %23, %24 : vector<8x8x32xf32>
    %26 = math.tanh %25 : vector<8x8x32xf32>
    %27 = vector.shape_cast %26 : vector<8x8x32xf32> to vector<64x32xf32>
    %c0_16 = arith.constant 0 : index
    %c0_17 = arith.constant 0 : index
    %28 = vector.load %arg10[%c0_16, %c0_17] : memref<32x4xf32, #tpu.memory_space<vmem>>, vector<32x4xf32>
    %cst_18 = arith.constant dense<0.000000e+00> : vector<64x4xf32>
    %29 = tpu.matmul %27, %28, %cst_18 {dimension_numbers = #tpu.dot_dimension_numbers<[1], [0], [0], [1], [0, 0, 1, 1], [], []>} : vector<64x32xf32>, vector<32x4xf32>, vector<64x4xf32> -> vector<64x4xf32>
    %c0_19 = arith.constant 0 : index
    %c0_20 = arith.constant 0 : index
    %30 = vector.load %arg11[%c0_19, %c0_20] : memref<1x4xf32, #tpu.memory_space<vmem>>, vector<1x4xf32>
    %31 = vector.broadcast %30 : vector<1x4xf32> to vector<64x4xf32>
    %32 = arith.addf %29, %31 : vector<64x4xf32>
    %33 = vector.shape_cast %32 : vector<64x4xf32> to vector<8x8x4xf32>
    %c0_21 = arith.constant 0 : index
    %c0_22 = arith.constant 0 : index
    %c0_23 = arith.constant 0 : index
    %34 = vector.load %arg7[%c0_21, %c0_22, %c0_23] : memref<1x8x1xf32, #tpu.memory_space<vmem>>, vector<1x8x1xf32>
    %35 = vector.shape_cast %34 : vector<1x8x1xf32> to vector<8x1xf32>
    %36 = vector.shape_cast %35 : vector<8x1xf32> to vector<8x1x1xf32>
    %c0_24 = arith.constant 0 : index
    %c0_25 = arith.constant 0 : index
    %c0_26 = arith.constant 0 : index
    %37 = vector.load %arg8[%c0_24, %c0_25, %c0_26] : memref<1x8x1xf32, #tpu.memory_space<vmem>>, vector<1x8x1xf32>
    %38 = vector.shape_cast %37 : vector<1x8x1xf32> to vector<8x1xf32>
    %39 = vector.shape_cast %38 : vector<8x1xf32> to vector<1x8x1xf32>
    %40 = vector.broadcast %36 : vector<8x1x1xf32> to vector<8x8x4xf32>
    %41 = arith.mulf %33, %40 : vector<8x8x4xf32>
    %cst_27 = arith.constant 1.000000e+00 : f32
    %42 = vector.broadcast %cst_27 : f32 to vector<8x1x1xf32>
    %43 = arith.subf %42, %36 : vector<8x1x1xf32>
    %cst_28 = arith.constant -9.99999995E+11 : f32
    %44 = vector.broadcast %cst_28 : f32 to vector<8x1x1xf32>
    %45 = arith.mulf %44, %43 : vector<8x1x1xf32>
    %46 = vector.broadcast %45 : vector<8x1x1xf32> to vector<8x8x4xf32>
    %47 = arith.addf %41, %46 : vector<8x8x4xf32>
    %48 = vector.broadcast %39 : vector<1x8x1xf32> to vector<8x8x4xf32>
    %49 = arith.mulf %47, %48 : vector<8x8x4xf32>
    %cst_29 = arith.constant 1.000000e+00 : f32
    %50 = vector.broadcast %cst_29 : f32 to vector<1x8x1xf32>
    %51 = arith.subf %50, %39 : vector<1x8x1xf32>
    %cst_30 = arith.constant -9.99999995E+11 : f32
    %52 = vector.broadcast %cst_30 : f32 to vector<1x8x1xf32>
    %53 = arith.mulf %52, %51 : vector<1x8x1xf32>
    %54 = vector.broadcast %53 : vector<1x8x1xf32> to vector<8x8x4xf32>
    %55 = arith.addf %49, %54 : vector<8x8x4xf32>
    %56 = tpu.iota {dimensions = array<i32: 0>} : vector<8x8x1xi32>
    %57 = vector.broadcast %0 : i32 to vector<8x8x1xi32>
    %58 = arith.addi %57, %56 : vector<8x8x1xi32>
    %59 = tpu.iota {dimensions = array<i32: 1>} : vector<8x8x1xi32>
    %60 = arith.cmpi sgt, %58, %59 : vector<8x8x1xi32>
    %cst_31 = arith.constant 9.99999995E+11 : f32
    %cst_32 = arith.constant 0.000000e+00 : f32
    %61 = vector.broadcast %cst_31 : f32 to vector<8x8x1xf32>
    %62 = vector.broadcast %cst_32 : f32 to vector<8x8x1xf32>
    %63 = arith.select %60, %61, %62 : vector<8x8x1xi1>, vector<8x8x1xf32>
    %64 = vector.broadcast %63 : vector<8x8x1xf32> to vector<8x8x4xf32>
    %65 = arith.subf %55, %64 : vector<8x8x4xf32>
    %66 = vector.shape_cast %65 : vector<8x8x4xf32> to vector<1x8x8x4xf32>
    %c0_33 = arith.constant 0 : index
    %c0_34 = arith.constant 0 : index
    %c0_35 = arith.constant 0 : index
    %c0_36 = arith.constant 0 : index
    %67 = vector.load %arg12[%c0_33, %c0_34, %c0_35, %c0_36] : memref<1x8x8x4xf32, #tpu.memory_space<vmem>>, vector<1x8x8x4xf32>
    tpu.vector_store %arg12[%c0_33, %c0_34, %c0_35, %c0_36], %66 {strides = array<i32>} : memref<1x8x8x4xf32, #tpu.memory_space<vmem>>, vector<1x8x8x4xf32>,
    return
  }
  func.func @transform_0(%arg0: i32, %arg1: i32) -> (i32, i32, i32) {
    %c0_i32 = arith.constant 0 : i32
    %c0_i32_0 = arith.constant 0 : i32
    return %arg1, %arg0, %c0_i32 : i32, i32, i32
  }
  func.func @transform_1(%arg0: i32, %arg1: i32) -> (i32, i32, i32) {
    %c0_i32 = arith.constant 0 : i32
    %c0_i32_0 = arith.constant 0 : i32
    %c0_i32_1 = arith.constant 0 : i32
    return %arg1, %c0_i32, %c0_i32_0 : i32, i32, i32
  }
  func.func @transform_2(%arg0: i32, %arg1: i32) -> (i32, i32, i32) {
    %c0_i32 = arith.constant 0 : i32
    %c0_i32_0 = arith.constant 0 : i32
    return %arg1, %arg0, %c0_i32 : i32, i32, i32
  }
  func.func @transform_3(%arg0: i32, %arg1: i32) -> (i32, i32, i32) {
    %c0_i32 = arith.constant 0 : i32
    %c0_i32_0 = arith.constant 0 : i32
    %c0_i32_1 = arith.constant 0 : i32
    return %arg1, %c0_i32, %c0_i32_0 : i32, i32, i32
  }
  func.func @transform_4(%arg0: i32, %arg1: i32) -> (i32, i32, i32) {
    %c0_i32 = arith.constant 0 : i32
    %c0_i32_0 = arith.constant 0 : i32
    %c0_i32_1 = arith.constant 0 : i32
    return %arg0, %c0_i32, %c0_i32_0 : i32, i32, i32
  }
  func.func @transform_5(%arg0: i32, %arg1: i32) -> (i32, i32, i32) {
    %c0_i32 = arith.constant 0 : i32
    %c0_i32_0 = arith.constant 0 : i32
    return %arg1, %arg0, %c0_i32 : i32, i32, i32
  }
  func.func @transform_6(%arg0: i32, %arg1: i32) -> (i32, i32, i32) {
    %c0_i32 = arith.constant 0 : i32
    %c0_i32_0 = arith.constant 0 : i32
    %c0_i32_1 = arith.constant 0 : i32
    return %arg1, %c0_i32, %c0_i32_0 : i32, i32, i32
  }
  func.func @transform_7(%arg0: i32, %arg1: i32) -> (i32, i32) {
    %c0_i32 = arith.constant 0 : i32
    %c0_i32_0 = arith.constant 0 : i32
    %c0_i32_1 = arith.constant 0 : i32
    return %c0_i32, %c0_i32_0 : i32, i32
  }
  func.func @transform_8(%arg0: i32, %arg1: i32) -> (i32, i32) {
    %c0_i32 = arith.constant 0 : i32
    %c0_i32_0 = arith.constant 0 : i32
    %c0_i32_1 = arith.constant 0 : i32
    return %c0_i32, %c0_i32_0 : i32, i32
  }
  func.func @transform_9(%arg0: i32, %arg1: i32) -> (i32, i32) {
    %c0_i32 = arith.constant 0 : i32
    %c0_i32_0 = arith.constant 0 : i32
    %c0_i32_1 = arith.constant 0 : i32
    return %c0_i32, %c0_i32_0 : i32, i32
  }
  func.func @transform_10(%arg0: i32, %arg1: i32) -> (i32, i32, i32, i32) {
    %c0_i32 = arith.constant 0 : i32
    %c0_i32_0 = arith.constant 0 : i32
    %c0_i32_1 = arith.constant 0 : i32
    return %arg1, %arg0, %c0_i32, %c0_i32_0 : i32, i32, i32, i32
  }
}

</mosaic_0001>

<bundles_post_ra>
// kernel: tpu_custom_call.1
= control target key start
LH: loop header
LB: loop body
LE: loop exit
PB: predicated region body
PF: predicated region fallthrough
CT: control target
= control target key end

     0   :  { %s2050_s0 = inlined_call_operand.hbm [shape: f32[2,8,32], index: 0, kind: input, shape index: {}]   ;;  %s2051_s1 = inlined_call_operand.hbm [shape: f32[2,8,32], index: 1, kind: input, shape index: {}]   ;;  %s2052_s2 = inlined_call_operand.hbm [shape: f32[2,8,32], index: 2, kind: input, shape index: {}]   ;;  %s2053_s3 = inlined_call_operand.hbm [shape: f32[2,8,32], index: 3, kind: input, shape index: {}]   ;;  %s2054_s4 = inlined_call_operand.vmem [shape: f32[8,8,32], index: 4, kind: input, shape index: {}]   ;;  %s2055_s5 = inlined_call_operand.vmem [shape: f32[2,8,1], index: 5, kind: input, shape index: {}]   ;;  %s2056_s6 = inlined_call_operand.vmem [shape: f32[2,8,1], index: 6, kind: input, shape index: {}]   ;;  %s2057_s7 = inlined_call_operand.hbm [shape: f32[32,32], index: 7, kind: input, shape index: {}]   ;;  %s2058_s8 = inlined_call_operand.vmem [shape: f32[32,4], index: 8, kind: input, shape index: {}]   ;;  %s2059_s9 = inlined_call_operand.vmem [shape: f32[1,4], index: 9, kind: input, shape index: {}]   ;;  %s2060_s10 = inlined_call_operand.vmem [shape: f32[2,8,8,4], index: 10, kind: output, shape index: {}]  }
   0x1   :  { %2066 = sst [smem:[#allocation18_spill]] %s2050_s0 }
   0x2   :  { %2067 = sst [smem:[#allocation19_spill]] %s2051_s1 }
   0x3   :  { %2068 = sst [smem:[#allocation20_spill]] %s2057_s7 }
   0x4   :  { %2069 = sst [smem:[#allocation21_spill]] %s2059_s9 }
   0x5   :  { %2070 = sst [smem:[#allocation22_spill]] %s2060_s10 }
   0x6   :  { %15 = vsyncpa [#allocation3], 0 }
   0x7   :  { %17 = vsyncpa [#allocation3 + $0x1], 0 }
   0x8   :  { %18 = vsyncpa [#allocation5], 0 }
   0x9   :  { %20 = vsyncpa [#allocation5 + $0x1], 0 }
   0xa   :  { %21 = vsyncpa [#allocation8], 0 }
   0xb   :  { %23 = vsyncpa [#allocation8 + $0x1], 0  ;;  %s1705_s13 = smov 0   ;;  %s1707_s14 = smov 0  }
   0xc   :  { %s1709_s15 = smov 0   ;;  %s1711_s16 = smov 0  }
   0xd   :  { %s1713_s17 = smov 0   ;;  %s1715_s18 = smov 0  }
   0xe LB: > { %2071 = sst [smem:[#allocation14_spill]] %s1631_s15  ;;  %s2061_s19 = sadd.s32 4294967295, %s1643_s18   ;;  %s1643_s18 = sphi %s1715_s18, %s29_s18   ;;  %s1639_s17 = sphi %s1713_s17, %s2089_s17   ;;  %s1635_s16 = sphi %s1711_s16, %s2092_s16   ;;  %s1631_s15 = sphi %s1709_s15, %s2087_s15   ;;  %s1627_s14 = sphi %s1707_s14, %s2091_s14   ;;  %s1623_s13 = sphi %s1705_s13, %s2090_s13  }
   0xf   : > { %2072 = sst [smem:[#allocation15_spill]] %s1639_s17  ;;  %p63_p0 = scmp.ne.s32.totalorder %s1627_s14, %s1623_s13 }
  0x10   : > { %p1737_p1 = scmp.eq.s32.totalorder %s2061_s19, 0  ;;  %p1270_p2 = scmp.ge.s32.totalorder %s1643_s18, 1 }
  0x11   : > { %p325_p3 = scmp.lt.s32.totalorder %s1643_s18, 3  ;;  %s2075_s7 = sld [smem:[#allocation20_spill]] }
  0x12   : > { %p1745_p4 = por %p1737_p1, %p63_p0  ;;  %s1645_s26 = smov [#allocation9]  }
  0x13   : > { %p1752_p5 = pnand %p1270_p2, %p325_p3  ;;  %s347_s27 = sshll.u32 %s1645_s26, 4  ;;  %s348_s27 = int_to_ptr.vmem [resolvable:$true] %s347_s27 }
  0x14   : > { %s1646_s28 = smov 128   ;;  %s1647_s29 = smov 8  }
  0x15   : > { %p1338_p6 = pneg %p1752_p5  ;;  %s38_s30 = sadd.s32 1, %s1639_s17 }
  0x16   : > { %p39_p8 = scmp.ge.s32.totalorder %s38_s30, 2  ;;  %s50_s11 = sadd.s32 1, %s1631_s15 }
  0x17   : > { %s345_s24 = sshll.u32 %s2075_s7, 4  ;;  %p1339_p7 = pnand %p1338_p6, %p1737_p1  ;;  %s346_s24 = int_to_ptr.hbm [resolvable:$true] %s345_s24 }
  0x18   : > { %p57_p9 = scmp.ne.s32.totalorder %s1631_s15, %s1627_s14  ;;  %p58_p10 = scmp.eq.s32.totalorder %s1643_s18, 0 }
  0x19   : > { %1341 = dma.hbm_to_vmem [thread:$0]  (!%p1339_p7), %s346_s24, 512, %s348_s27, [#allocation8], %s1646_s28, %s1646_s28, %s1647_s29  }
  0x1a   : > { %s2094_s30 = smov (%p39_p8, %s38_s30), 0  ;;  %p59_p11 = por %p58_p10, %p57_p9 }
  0x1b   : > { %2077 = sst [smem:[#allocation16_spill]] %s2094_s30  ;;  %p1356_p12 = scmp.lt.s32.totalorder %s1643_s18, 2 }
  0x1c   : > { %s45_s12 = ssub.s32 %s1639_s17, %s2094_s30  ;;  %s367_s13 = sand.u32 1, %s1631_s15  }
  0x1d   : > { %p48_p13 = scmp.eq.s32.totalorder %s45_s12, 0  ;;  %s1771_s22 = sshll.u32 %s367_s13, 3 }
  0x1e   : > { %s1774_s23 = sshll.u32 %s1639_s17, 3  ;;  %p1776_p0 = pnand %p1356_p12, %p59_p11 }
  0x1f   : > { %s1781_s26 = scalar_select %p48_p13, %s1631_s15, %s50_s11  }
  0x20   : > { %s2065_s27 = sand.u32 1, %s1643_s18   ;;  %s2080_s1 = sld [smem:[#allocation19_spill]] }
  0x21   : > { %2079 = sst [smem:[#allocation17_spill]] %s1781_s26  ;;  %s391_s19 = scalar_lea.vmem [#allocation4], %s1771_s22 }
  0x22   : > { %s399_s7 = sshll.u32 %s391_s19, 4  ;;  %s388_s17 = scalar_lea.sflag [#allocation5], %s2065_s27  ;;  %s400_s7 = int_to_ptr.vmem [resolvable:$true] %s399_s7 }
  0x23   : > { %s2081_s0 = sld [smem:[#allocation18_spill]]  ;;  %s371_s28 = scalar_lea.vmem [#allocation2], %s1771_s22 }
  0x24   : > { %s380_s29 = sshll.u32 %s371_s28, 4  ;;  %s368_s19 = scalar_lea.sflag [#allocation3], %s367_s13  ;;  %s381_s29 = int_to_ptr.vmem [resolvable:$true] %s380_s29 }
  0x25   : > { %s434_s28 = scalar_lea.hbm %s2053_s3, %s1774_s23  ;;  %s466_s27 = sand.u32 (!%p1752_p5), 1, %s1627_s14  }
  0x26   : > { %s395_s12 = scalar_lea.hbm %s2080_s1, %s1774_s23  ;;  %s436_s9 = sshll.u32 %s434_s28, 4  ;;  %s437_s9 = int_to_ptr.hbm [resolvable:$true] %s436_s9 }
  0x27   : > { %s397_s30 = sshll.u32 %s395_s12, 4  ;;  %s398_s30 = int_to_ptr.hbm [resolvable:$true] %s397_s30 }
  0x28   : > { %1348 = dma.hbm_to_vmem [thread:$0]  (!%p1776_p0), %s398_s30, 128, %s400_s7, %s388_s17  }
  0x29   : > { %s376_s15 = scalar_lea.hbm %s2081_s0, %s1774_s23  ;;  %s415_s7 = scalar_lea.hbm %s2052_s2, %s1774_s23 }
  0x2a   : > { %s378_s1 = sshll.u32 %s376_s15, 4  ;;  %s410_s30 = scalar_lea.vmem [#allocation6], %s1771_s22  ;;  %s379_s1 = int_to_ptr.hbm [resolvable:$true] %s378_s1 }
  0x2b   : > { %1345 = dma.hbm_to_vmem [thread:$0]  (!%p1776_p0), %s379_s1, 128, %s381_s29, %s368_s19  }
  0x2c   : > { %s419_s10 = sshll.u32 %s410_s30, 4  ;;  %s417_s26 = sshll.u32 %s415_s7, 4  ;;  %s420_s10 = int_to_ptr.vmem [resolvable:$true] %s419_s10  ;;  %s418_s26 = int_to_ptr.hbm [resolvable:$true] %s417_s26 }
  0x2d   : > { %1351 = dma.hbm_to_vmem [thread:$0]  (!%p1776_p0), %s418_s26, 128, %s420_s10, %s388_s17  }
  0x2e   : > { %s430_s0 = scalar_lea.vmem [#allocation7], %s1771_s22  ;;  %s2082_s1 = sand.u32 1, %s1643_s18  }
  0x2f   : > { %s438_s13 = sshll.u32 %s430_s0, 4  ;;  %s427_s29 = scalar_lea.sflag [#allocation8], %s2082_s1  ;;  %s439_s13 = int_to_ptr.vmem [resolvable:$true] %s438_s13 }
  0x30   : > { %1354 = dma.hbm_to_vmem [thread:$0]  (!%p1776_p0), %s437_s9, 128, %s439_s13, %s427_s29  }
  0x31   : > { %464 = sbr.rel (%p1752_p5) target bundleno = 386 (0x182), region = 60  ;;  %s1819_s10 = sshll.u32 (!%p1752_p5), %s466_s27, 3 }
  0x32   : > { %s467_s17 = scalar_lea.sflag (!%p1752_p5), [#allocation3], %s466_s27  ;;  %s470_s23 = scalar_lea.vmem (!%p1752_p5), [#allocation2], %s1819_s10 }
  0x36   : > { %1606 = dma.done.wait (%p1745_p4), %s467_s17, 128  }
  0x37   : > { %1608 = vsyncadd (%p1745_p4), %s467_s17, 4294967168  ;;  %s2083_s0 = sadd.s32 4294967295, %s1643_s18   ;;  %s480_s22 = scalar_lea.vmem [#allocation4], %s1819_s10 }
  0x38   : > { %s476_s9 = sand.u32 1, %s2083_s0  }
  0x39   : > { %s477_s25 = scalar_lea.sflag [#allocation5], %s476_s9 }
  0x3a   : > { %1610 = dma.done.wait (%p1745_p4), %s477_s25, 256  }
  0x3b   : > { %1612 = vsyncadd (%p1745_p4), %s477_s25, 4294967040  ;;  %s490_s24 = scalar_lea.vmem [#allocation6], %s1819_s10  ;;  %s497_s19 = scalar_lea.sflag [#allocation8], %s476_s9 }
  0x3c   : > { %s500_s12 = scalar_lea.vmem [#allocation7], %s1819_s10 }
  0x3d   : > { %1614 = dma.done.wait (%p1745_p4), %s497_s19, 128  }
  0x3e   : > { %1616 = vsyncadd (%p1745_p4), %s497_s19, 4294967168 }
  0x3f   : > { %1618 = dma.done.wait (%p1737_p1), [#allocation8], 512  }
  0x40   : > { %1620 = vsyncadd (%p1737_p1), [#allocation8], 4294966784  ;;  %p584_p2 = scmp.lt.s32.totalorder %s1635_s16, 1  ;;  %v643_v0 = vld [vmem:[#allocation9 + $0x18] sm:$0xff]  ;;  %v642_v1 = vld [vmem:[#allocation9 + $0x10] sm:$0xff]  ;;  %v1648_v7 = vmov 0  }
  0x41   : > { %681 = vmatpush.msra.mxu0 %v643_v0  ;;  %1318 = vmatpush.msra.mxu2 %v643_v0  ;;  %v606_v2 = vld [vmem:[%s470_s23] sm:$0xff]  ;;  %v607_v3 = vld [vmem:[%s480_s22] sm:$0xff]  ;;  %vm644_vm0 = vcmask 261120   ;;  %s2084_s27 = sld [smem:[#allocation21_spill]]  ;;  %vm1048_vm1 = vcmask 31744  }
  0x42   : > { %s2096_s16 = smov (!%p584_p2, %s1635_s16), 1  ;;  %v641_v4 = vld [vmem:[#allocation9 + $0x8] sm:$0xff]  ;;  %v616_v5 = vperm.slane %v606_v2, 0  ;;  %v612_v6 = vrot.slane %v606_v2, 4  ;;  %1411 = vset.pattern.permute.xlu0 %v1648_v7  ;;  %1412 = vset.pattern.permute.xlu1 %v1648_v7  ;;  %v640_v9 = vld [vmem:[#allocation9] sm:$0xff]  ;;  %v609_v12 = vrot.slane %v606_v2, 1 }
  0x43   : > { %s1288_s7 = sshll.u32 %s2096_s16, 3  ;;  %682 = vmatpush.msra.mxu0 %v642_v1  ;;  %1319 = vmatpush.msra.mxu2 %v642_v1  ;;  %v613_v13 = vrot.slane %v606_v2, 5  ;;  %v610_v24 = vrot.slane %v606_v2, 2  ;;  %v614_v25 = vrot.slane %v606_v2, 6  ;;  %v611_v32 = vrot.slane %v606_v2, 3  ;;  %v779_v45 = vld [vmem:[%s2058_s8 + $0x18] sm:$0xff] }
  0x44   : > { %s590_s26 = scalar_lea.vmem %s2055_s5, %s1288_s7  ;;  %v632_v10 = vmul.f32 %v616_v5, %v607_v3  ;;  %v620_v11 = vperm.slane %v612_v6, 0  ;;  %1413 = vset.pattern.permute.xlu2 %v1648_v7  ;;  %v617_v17 = vperm.slane %v609_v12, 0  ;;  %v615_v33 = vrot.slane %v606_v2, 7  ;;  %820 = vmatpush.msra.mxu1 %v779_v45  ;;  %v778_v48 = vld [vmem:[%s2058_s8 + $0x10] sm:$0xff]  ;;  %v777_v51 = vld [vmem:[%s2058_s8 + $0x8] sm:$0xff]  ;;  %v776_v55 = vld [vmem:[%s2058_s8] sm:$0xff]  ;;  %s594_s0 = scalar_lea.vmem %s2056_s6, %s1288_s7 }
  0x45   : > { %v1853_v8 = vld [vmem:[%s590_s26] sm:$0xff]  ;;  %683 = vmatpush.msra.mxu0 %v641_v4  ;;  %1320 = vmatpush.msra.mxu2 %v641_v4  ;;  %v621_v18 = vperm.slane %v613_v13, 0  ;;  %v618_v28 = vperm.slane %v610_v24, 0  ;;  %v622_v29 = vperm.slane %v614_v25, 0  ;;  %v619_v34 = vperm.slane %v611_v32, 0  ;;  %s1317_s17 = sshll.u32 %s2096_s16, 6 }
  0x46   : > { %v636_v14 = vmul.f32 %v620_v11, %v607_v3  ;;  %v866_v15 = vperm.slane %v1853_v8, 0  ;;  %v852_v16 = vrot.slane %v1853_v8, 2  ;;  %v851_v20 = vrot.slane %v1853_v8, 1  ;;  %1322 = vmatpush.msra.mxu3 %v779_v45  ;;  %821 = vmatpush.msra.mxu1 %v778_v48  ;;  %v865_v4 = vld [vmem:[%s594_s0] sm:$0xff]  ;;  %v1903_v11 = vld [vmem:[%s500_s12] sm:$0xff]  ;;  %s2085_s9 = sld [smem:[#allocation22_spill]] }
  0x47   : > { %684 = vmatpush.msra.mxu0 %v640_v9  ;;  %1321 = vmatpush.msra.mxu2 %v640_v9  ;;  %v853_v21 = vrot.slane %v1853_v8, 3  ;;  %v633_v22 = vmul.f32 %v617_v17, %v607_v3  ;;  %v637_v23 = vmul.f32 %v621_v18, %v607_v3  ;;  %v634_v30 = vmul.f32 %v618_v28, %v607_v3  ;;  %v756_v25 = vld [vmem:[%s2054_s4 + $0x20] sm:$0xff] }
  0x48   : > { %1292 = vmatmul.msk.f32.vlgmr.msra.gmra.mxu0 %vm644_vm0, %v632_v10  ;;  %1296 = vmatmul.msk.f32.vlgmr.msra.gmra.mxu2 %vm644_vm0, %v636_v14  ;;  %v868_v19 = vperm.slane %v852_v16, 0  ;;  %v867_v26 = vperm.slane %v851_v20, 0  ;;  %v638_v31 = vmul.f32 %v622_v29, %v607_v3  ;;  %v623_v35 = vperm.slane %v615_v33, 0 }
  0x49   : > { %875 = vperm.xlu0 %1411, %v866_v15   ;;  %v869_v27 = vperm.slane %v853_v21, 0  ;;  %v635_v36 = vmul.f32 %v619_v34, %v607_v3  ;;  %v856_v38 = vrot.slane %v1853_v8, 6  ;;  %v857_v40 = vrot.slane %v1853_v8, 7  ;;  %1323 = vmatpush.msra.mxu3 %v778_v48  ;;  %v752_v15 = vld [vmem:[%s2054_s4] sm:$0xff]  ;;  %v754_v48 = vld [vmem:[%s2054_s4 + $0x10] sm:$0xff] }
  0x4a   : > { %883 = vperm.xlu1 %1412, %v868_v19   ;;  %v639_v37 = vmul.f32 %v623_v35, %v607_v3  ;;  %v915_v42 = vsub.f32 1.0, %v851_v20  ;;  %v916_v44 = vsub.f32 1.0, %v852_v16  ;;  %v854_v50 = vrot.slane %v1853_v8, 4  ;;  %822 = vmatpush.msra.mxu1 %v777_v51  ;;  %v1895_v3 = vld [vmem:[%s490_s24] sm:$0xff] }
  0x4b   : > { %v872_v39 = vperm.slane %v856_v38, 0  ;;  %v873_v41 = vperm.slane %v857_v40, 0  ;;  %v855_v54 = vrot.slane %v1853_v8, 5  ;;  %1324 = vmatpush.msra.mxu3 %v777_v51  ;;  %v921_v62 = vsub.f32 1.0, %v857_v40 }
  0x4c   : > { %v923_v43 = vmul.f32 -1e+12, %v915_v42  ;;  %v924_v47 = vmul.f32 -1e+12, %v916_v44  ;;  %v870_v52 = vperm.slane %v854_v50, 0  ;;  %v918_v53 = vsub.f32 1.0, %v854_v50  ;;  %823 = vmatpush.msra.mxu1 %v776_v55  ;;  %s1976_s25 = scalar_lea.vmem %s2085_s9, %s1317_s17 }
  0x4d   : > { %v919_v57 = vsub.f32 1.0, %v855_v54  ;;  %1325 = vmatpush.msra.mxu3 %v776_v55  ;;  %v871_v61 = vperm.slane %v855_v54, 0  ;;  %v929_v63 = vmul.f32 -1e+12, %v921_v62  ;;  %v914_v1 = vsub.f32 1.0, %v1853_v8  ;;  %v757_v42 = vld [vmem:[%s2054_s4 + $0x28] sm:$0xff] }
  0x4e   : > { %v939_v46 = vperm.slane %v923_v43, 0  ;;  %v940_v49 = vperm.slane %v924_v47, 0  ;;  %891 = vperm.xlu2 %1413, %v870_v52   ;;  %v926_v56 = vmul.f32 -1e+12, %v918_v53  ;;  %v719_v6 = vperm.slane %v1895_v3, 0 }
  0x4f   : > { %v927_v59 = vmul.f32 -1e+12, %v919_v57  ;;  %v945_v0 = vperm.slane %v929_v63, 0  ;;  %v922_v2 = vmul.f32 -1e+12, %v914_v1  ;;  %v715_v7 = vrot.slane %v1895_v3, 4 }
  0x50   : > { %1293 = vmatmul.msk.f32.gmra.mxu0 %vm644_vm0, %v633_v22  ;;  %1297 = vmatmul.msk.f32.gmra.mxu2 %vm644_vm0, %v637_v23  ;;  %v942_v58 = vperm.slane %v926_v56, 0  ;;  %v917_v9 = vsub.f32 1.0, %v853_v21  ;;  %v712_v13 = vrot.slane %v1895_v3, 1  ;;  %v716_v23 = vrot.slane %v1895_v3, 5  ;;  %v755_v63 = vld [vmem:[%s2054_s4 + $0x18] sm:$0xff] }
  0x51   : > { %879 = vperm.xlu0 %1411, %v867_v26   ;;  %v943_v60 = vperm.slane %v927_v59, 0  ;;  %v938_v5 = vperm.slane %v922_v2, 0  ;;  %v723_v17 = vperm.slane %v715_v7, 0  ;;  %v920_v24 = vsub.f32 1.0, %v856_v38  ;;  %v758_v59 = vld [vmem:[%s2054_s4 + $0x30] sm:$0xff] }
  0x52   : > { %887 = vperm.xlu1 %1412, %v869_v27   ;;  %v925_v14 = vmul.f32 -1e+12, %v917_v9  ;;  %v720_v20 = vperm.slane %v712_v13, 0  ;;  %v713_v29 = vrot.slane %v1895_v3, 2  ;;  %v724_v8 = vperm.slane %v716_v23, 0  ;;  %v759_v9 = vld [vmem:[%s2054_s4 + $0x38] sm:$0xff] }
  0x53   : > { %v999_v38 = vsub.f32 1.0, %v865_v4 }
  0x54   : > { %v941_v18 = vperm.slane %v925_v14, 0 }
  0x55   : > { %v1000_v47 = vmul.f32 -1e+12, %v999_v38 }
  0x56   : > { %895 = vperm.xlu2 %1413, %v871_v61  }
  0x58   : > { %1294 = vmatmul.msk.f32.gmra.mxu0 %vm644_vm0, %v634_v30  ;;  %1298 = vmatmul.msk.f32.gmra.mxu2 %vm644_vm0, %v638_v31  ;;  %v928_v30 = vmul.f32 -1e+12, %v920_v24  ;;  %v753_v31 = vld [vmem:[%s2054_s4 + $0x8] sm:$0xff] }
  0x59   : > { %899 = vperm.xlu0 %1411, %v872_v39  }
  0x5a   : > { %903 = vperm.xlu1 %1412, %v873_v41   ;;  %v944_v34 = vperm.slane %v928_v30, 0  ;;  %v717_v41 = vrot.slane %v1895_v3, 6 }
  0x5c   : > { %v725_v52 = vperm.slane %v717_v41, 0 }
  0x5e   : > { %947 = vperm.xlu2 %1413, %v938_v5  }
  0x60   : > { %1295 = vmatmul.msk.f32.gmra.mxu0 %vm644_vm0, %v635_v36  ;;  %1299 = vmatmul.msk.f32.gmra.mxu2 %vm644_vm0, %v639_v37  ;;  %v721_v37 = vperm.slane %v713_v29, 0 }
  0x61   : > { %951 = vperm.xlu0 %1411, %v939_v46   ;;  %v714_v46 = vrot.slane %v1895_v3, 3 }
  0x62   : > { %955 = vperm.xlu1 %1412, %v940_v49  }
  0x63   : > { %v722_v55 = vperm.slane %v714_v46, 0 }
  0x66   : > { %959 = vperm.xlu2 %1413, %v941_v18  }
  0x69   : > { %963 = vperm.xlu0 %1411, %v942_v58   ;;  %v718_v58 = vrot.slane %v1895_v3, 7 }
  0x6a   : > { %967 = vperm.xlu1 %1412, %v943_v60  }
  0x6e   : > { %971 = vperm.xlu2 %1413, %v944_v34  }
  0x71   : > { %975 = vperm.xlu0 %1411, %v945_v0  }
  0x72   : > { %988 = vperm.xlu1 %1412, %v865_v4   ;;  %v726_v4 = vperm.slane %v718_v58, 0 }
  0x76   : > { %1003 = vperm.xlu2 %1413, %v1000_v47  }
  0xc5   : > { %v686_v10 = vpop.f32.mrf.mxu0 }
  0xc6   : > { %v735_v12 = vadd.f32 %v719_v6, %v686_v10 }
  0xc8   : > { %v744_v16 = vadd.f32 %v1903_v11, %v735_v12 }
  0xca   : > { %v760_v19 = vadd.f32 %v752_v15, %v744_v16  ;;  %v884_v16 = vpop.permute.xlu1 %883 }
  0xcb   : > { %v698_v21 = vpop.f32.mrf.mxu2 }
  0xcc   : > { %1415 = vtanh.f32 %v760_v19  ;;  %v739_v22 = vadd.f32 %v723_v17, %v698_v21  ;;  %v892_v17 = vpop.permute.xlu2 %891 }
  0xcd   : > { %v689_v26 = vpop.f32.mrf.mxu0 }
  0xce   : > { %v748_v27 = vadd.f32 %v1903_v11, %v739_v22  ;;  %v736_v28 = vadd.f32 %v720_v20, %v689_v26  ;;  %v876_v20 = vpop.permute.xlu0 %875 }
  0xd0   : > { %v764_v32 = vadd.f32 %v756_v25, %v748_v27  ;;  %v745_v33 = vadd.f32 %v1903_v11, %v736_v28  ;;  %v1964_v27 = vld [vmem:[%s2084_s27] ss:$0 sm:$0xff] }
  0xd2   : > { %v1416_v35 = vpop.eup %1415  ;;  %1417 = vtanh.f32 %v764_v32  ;;  %v761_v36 = vadd.f32 %v753_v31, %v745_v33  ;;  %v1953_v18 = vpop.permute.xlu1 %887  ;;  %v1022_v33 = vlaneseq }
  0xd3   : > { %v701_v39 = vpop.f32.mrf.mxu2  ;;  %1300 = vmatmul.msk.f32.vlgmr.msra.gmra.mxu1 %vm644_vm0, %v1416_v35 }
  0xd4   : > { %1419 = vtanh.f32 %v761_v36  ;;  %v740_v40 = vadd.f32 %v724_v8, %v701_v39  ;;  %v896_v19 = vpop.permute.xlu2 %895 }
  0xd5   : > { %v692_v43 = vpop.f32.mrf.mxu0 }
  0xd6   : > { %v749_v44 = vadd.f32 %v1903_v11, %v740_v40  ;;  %v737_v45 = vadd.f32 %v721_v37, %v692_v43  ;;  %v880_v22 = vpop.permute.xlu0 %879  ;;  %v1982_v40 = vshrl.u32 %v1022_v33, 7 }
  0xd8   : > { %v1418_v49 = vpop.eup %1417  ;;  %v765_v50 = vadd.f32 %v757_v42, %v749_v44  ;;  %v746_v51 = vadd.f32 %v1903_v11, %v737_v45  ;;  %vm1308_vm2 = vcmp.lt.s32.totalorder %v1982_v40, 1  ;;  %vm1311_vm3 = vcmp.lt.s32.totalorder %v1982_v40, 4 }
  0xd9   : > { %1304 = vmatmul.msk.f32.vlgmr.msra.gmra.mxu3 %vm644_vm0, %v1418_v49  ;;  %vm1309_vm4 = vcmp.lt.s32.totalorder %v1982_v40, 2  ;;  %vm1312_vm5 = vcmp.lt.s32.totalorder %v1982_v40, 5  ;;  %vm1310_vm6 = vcmp.lt.s32.totalorder %v1982_v40, 3  ;;  %vm1313_vm7 = vcmp.lt.s32.totalorder %v1982_v40, 6 }
  0xda   : > { %v1420_v53 = vpop.eup %1419  ;;  %1421 = vtanh.f32 %v765_v50  ;;  %v762_v54 = vadd.f32 %v754_v48, %v746_v51  ;;  %v1955_v21 = vpop.permute.xlu1 %903  ;;  %v1649_v48 = vmov 0.0   ;;  %vm1314_vm8 = vcmp.lt.s32.totalorder %v1982_v40, 7 }
  0xdb   : > { %v704_v56 = vpop.f32.mrf.mxu2  ;;  %1301 = vmatmul.msk.f32.gmra.mxu1 %vm644_vm0, %v1420_v53  ;;  %v1033_v49 = vsel %vm1308_vm2, 1e+12, %v1649_v48 }
  0xdc   : > { %1423 = vtanh.f32 %v762_v54  ;;  %v741_v57 = vadd.f32 %v725_v52, %v704_v56 }
  0xdd   : > { %v695_v60 = vpop.f32.mrf.mxu0 }
  0xde   : > { %v750_v61 = vadd.f32 %v1903_v11, %v741_v57  ;;  %v738_v62 = vadd.f32 %v722_v55, %v695_v60  ;;  %v1959_v25 = vpop.permute.xlu0 %899  ;;  %v1036_v57 = vsel %vm1311_vm3, 1e+12, %v1649_v48 }
  0xe0   : > { %v1422_v0 = vpop.eup %1421  ;;  %v766_v1 = vadd.f32 %v758_v59, %v750_v61  ;;  %v747_v2 = vadd.f32 %v1903_v11, %v738_v62 }
  0xe1   : > { %1305 = vmatmul.msk.f32.gmra.mxu3 %vm644_vm0, %v1422_v0 }
  0xe2   : > { %v1424_v3 = vpop.eup %1423  ;;  %1425 = vtanh.f32 %v766_v1  ;;  %v763_v5 = vadd.f32 %v755_v63, %v747_v2  ;;  %v956_v23 = vpop.permute.xlu1 %955  ;;  %v1034_v1 = vsel %vm1309_vm4, 1e+12, %v1649_v48 }
  0xe3   : > { %v707_v6 = vpop.f32.mrf.mxu2  ;;  %1302 = vmatmul.msk.f32.gmra.mxu1 %vm644_vm0, %v1424_v3 }
  0xe4   : > { %1427 = vtanh.f32 %v763_v5  ;;  %v742_v7 = vadd.f32 %v726_v4, %v707_v6 }
  0xe6   : > { %v751_v10 = vadd.f32 %v1903_v11, %v742_v7  ;;  %v948_v11 = vpop.permute.xlu2 %947  ;;  %v952_v8 = vpop.permute.xlu0 %951 }
  0xe8   : > { %v1426_v12 = vpop.eup %1425  ;;  %v767_v13 = vadd.f32 %v759_v9, %v751_v10  ;;  %v1037_v10 = vsel %vm1312_vm5, 1e+12, %v1649_v48 }
  0xe9   : > { %1306 = vmatmul.msk.f32.gmra.mxu3 %vm644_vm0, %v1426_v12 }
  0xea   : > { %v1428_v14 = vpop.eup %1427  ;;  %1429 = vtanh.f32 %v767_v13  ;;  %v968_v26 = vpop.permute.xlu1 %967 }
  0xeb   : > { %1303 = vmatmul.msk.f32.gmra.mxu1 %vm644_vm0, %v1428_v14 }
  0xee   : > { %v1957_v24 = vpop.permute.xlu2 %959  ;;  %v964_v47 = vpop.permute.xlu0 %963 }
  0xf0   : > { %v1430_v15 = vpop.eup %1429 }
  0xf1   : > { %1307 = vmatmul.msk.f32.gmra.mxu3 %vm644_vm0, %v1430_v15 }
  0xf2   : > { %v1970_v34 = vpop.permute.xlu1 %988 }
  0xf6   : > { %v1966_v28 = vpop.permute.xlu2 %971 }
  0xfe   : > { %v1978_v36 = vpop.permute.xlu2 %1003 }
 0x150   : > { %v825_v29 = vpop.f32.mrf.mxu1 }
 0x151   : > { %v826_v30 = vadd.f32 %v1964_v27, %v825_v29 }
 0x153   : > { %v906_v31 = vmul.f32 %v876_v20, %v826_v30 }
 0x155   : > { %v978_v32 = vadd.f32 %v948_v11, %v906_v31 }
 0x157   : > { %v991_v35 = vmul.f32 %v1970_v34, %v978_v32  ;;  %v976_v32 = vpop.permute.xlu0 %975 }
 0x158   : > { %v828_v37 = vpop.f32.mrf.mxu1 }
 0x159   : > { %v1006_v38 = vadd.f32 %v1978_v36, %v991_v35  ;;  %v829_v39 = vadd.f32 %v1964_v27, %v828_v37 }
 0x15b   : > { %1049 = vst.msk [vmem:[%s1976_s25] sm:$0xff] %vm1048_vm1, %v1006_v38  ;;  %v907_v41 = vmul.f32 %v880_v22, %v829_v39 }
 0x15c   : > { %v837_v42 = vpop.f32.mrf.mxu3 }
 0x15d   : > { %v979_v43 = vadd.f32 %v952_v8, %v907_v41  ;;  %v838_v44 = vadd.f32 %v1964_v27, %v837_v42  ;;  %v1039_v8 = vsel %vm1314_vm8, 1e+12, %v1649_v48 }
 0x15f   : > { %v992_v45 = vmul.f32 %v1970_v34, %v979_v43  ;;  %v910_v46 = vmul.f32 %v892_v17, %v838_v44 }
 0x160   : > { %v831_v50 = vpop.f32.mrf.mxu1 }
 0x161   : > { %v1007_v51 = vadd.f32 %v1978_v36, %v992_v45  ;;  %v982_v52 = vadd.f32 %v964_v47, %v910_v46  ;;  %v832_v53 = vadd.f32 %v1964_v27, %v831_v50 }
 0x163   : > { %v1041_v54 = vsub.f32 %v1007_v51, %v1033_v49  ;;  %v995_v55 = vmul.f32 %v1970_v34, %v982_v52  ;;  %v908_v56 = vmul.f32 %v884_v16, %v832_v53 }
 0x164   : > { %v840_v58 = vpop.f32.mrf.mxu3 }
 0x165   : > { %1050 = vst.msk [vmem:[%s1976_s25 + $0x8] sm:$0xff] %vm1048_vm1, %v1041_v54  ;;  %v1010_v59 = vadd.f32 %v1978_v36, %v995_v55  ;;  %v980_v60 = vadd.f32 %v956_v23, %v908_v56  ;;  %v841_v61 = vadd.f32 %v1964_v27, %v840_v58 }
 0x167   : > { %v1044_v62 = vsub.f32 %v1010_v59, %v1036_v57  ;;  %v993_v63 = vmul.f32 %v1970_v34, %v980_v60  ;;  %v911_v0 = vmul.f32 %v896_v19, %v841_v61 }
 0x168   : > { %v834_v2 = vpop.f32.mrf.mxu1 }
 0x169   : > { %1053 = vst.msk [vmem:[%s1976_s25 + $0x20] sm:$0xff] %vm1048_vm1, %v1044_v62  ;;  %v1008_v4 = vadd.f32 %v1978_v36, %v993_v63  ;;  %v983_v3 = vadd.f32 %v968_v26, %v911_v0  ;;  %v835_v5 = vadd.f32 %v1964_v27, %v834_v2 }
 0x16b   : > { %v1042_v6 = vsub.f32 %v1008_v4, %v1034_v1  ;;  %v996_v7 = vmul.f32 %v1970_v34, %v983_v3  ;;  %v909_v9 = vmul.f32 %v1953_v18, %v835_v5  ;;  %v1035_v18 = vsel %vm1310_vm6, 1e+12, %v1649_v48 }
 0x16c   : > { %v843_v12 = vpop.f32.mrf.mxu3 }
 0x16d   : > { %1051 = vst.msk [vmem:[%s1976_s25 + $0x10] sm:$0xff] %vm1048_vm1, %v1042_v6  ;;  %v1011_v13 = vadd.f32 %v1978_v36, %v996_v7  ;;  %v981_v14 = vadd.f32 %v1957_v24, %v909_v9  ;;  %v844_v15 = vadd.f32 %v1964_v27, %v843_v12  ;;  %v1038_v24 = vsel %vm1313_vm7, 1e+12, %v1649_v48 }
 0x16f   : > { %v1045_v16 = vsub.f32 %v1011_v13, %v1037_v10  ;;  %v994_v17 = vmul.f32 %v1970_v34, %v981_v14  ;;  %v912_v19 = vmul.f32 %v1959_v25, %v844_v15 }
 0x171   : > { %1054 = vst.msk [vmem:[%s1976_s25 + $0x28] sm:$0xff] %vm1048_vm1, %v1045_v16  ;;  %v1009_v20 = vadd.f32 %v1978_v36, %v994_v17  ;;  %v984_v11 = vadd.f32 %v1966_v28, %v912_v19 }
 0x173   : > { %v1043_v22 = vsub.f32 %v1009_v20, %v1035_v18  ;;  %v997_v23 = vmul.f32 %v1970_v34, %v984_v11 }
 0x174   : > { %v846_v26 = vpop.f32.mrf.mxu3 }
 0x175   : > { %1052 = vst.msk [vmem:[%s1976_s25 + $0x18] sm:$0xff] %vm1048_vm1, %v1043_v22  ;;  %v1012_v25 = vadd.f32 %v1978_v36, %v997_v23  ;;  %v847_v29 = vadd.f32 %v1964_v27, %v846_v26 }
 0x177   : > { %v1046_v30 = vsub.f32 %v1012_v25, %v1038_v24  ;;  %v913_v31 = vmul.f32 %v1955_v21, %v847_v29 }
 0x179   : > { %1055 = vst.msk [vmem:[%s1976_s25 + $0x30] sm:$0xff] %vm1048_vm1, %v1046_v30  ;;  %v985_v28 = vadd.f32 %v976_v32, %v913_v31 }
 0x17b   : > { %v998_v33 = vmul.f32 %v1970_v34, %v985_v28 }
 0x17d   : > { %v1013_v35 = vadd.f32 %v1978_v36, %v998_v33 }
 0x17f   : > { %v1047_v37 = vsub.f32 %v1013_v35, %v1039_v8 }
 0x181   : > { %1056 = vst.msk [vmem:[%s1976_s25 + $0x38] sm:$0xff] %vm1048_vm1, %v1047_v37 }
 0x182 PF: > { %s29_s18 = sadd.s32 1, %s1643_s18   ;;  %s2086_s16 = sld [smem:[#allocation14_spill]] }
 0x183   : > { %p26_p1 = scmp.ge.s32.totalorder %s29_s18, 4   ;;  %s2087_s15 = sld [smem:[#allocation17_spill]] }
 0x184   : > { %s2088_s10 = sld [smem:[#allocation15_spill]]  ;;  %s2090_s13 = smov %s1627_s14 }
 0x185   : > { %s2089_s17 = sld [smem:[#allocation16_spill]] }
 0x186   :  { %28 = sbr.rel (!%p26_p1) target bundleno = 14 (0xe), region = 150 }
 0x188   : > { %s2091_s14 = smov %s2086_s16 }
 0x18a   : > { %s2092_s16 = smov %s2088_s10 }
 0x18b   :  { %1087 = vsyncpa [#allocation3], 1 }
 0x18c   :  { %1089 = vsyncpa [#allocation3 + $0x1], 1 }
 0x18d   :  { %1090 = vsyncpa [#allocation5], 1 }
 0x18e   :  { %1092 = vsyncpa [#allocation5 + $0x1], 1 }
 0x18f   :  { %1093 = vsyncpa [#allocation8], 1 }
 0x190   :  { %1095 = vsyncpa [#allocation8 + $0x1], 1 }

</bundles_post_ra>
